<compile_context>
chip_gen: v6e
topology: v6e:2x2x1
jax: 0.10.0
libtpu: 0.0.40
codegen_flags: <defaults>
</compile_context>

<pallas_src>
import functools
import math

import jax
import jax.numpy as jnp
from jax.experimental import pallas as pl
from jax.experimental.pallas import tpu as pltpu


def _round_up(x, m):
    return ((x + m - 1) // m) * m


def _emo_kernel(starts_ref, lens_ref, emo_ref, ebd_ref, out_ref, pack_ref,
                *, b_tile, max_len_pad):
    """One grid step = b_tile batch elements.

    starts_ref / lens_ref : SMEM scalar-prefetch (B_pad,) int32
    emo_ref               : (T_al_pad, C)  aligned flat emo frames, VMEM
    ebd_ref               : (C, H)         style embedding, VMEM
    out_ref               : (b_tile*max_len_pad, H) flat output block
    pack_ref              : (b_tile*max_len_pad, C) VMEM scratch (packed rows)
    """
    g = pl.program_id(0)

    # Gather + zero-mask b_tile sequence windows into one sublane-aligned
    # packed block (this is the out_emo_tensor construction of the reference).
    for t in range(b_tile):
        b = g * b_tile + t
        start = pl.multiple_of(starts_ref[b], 8)   # host guarantees 8-aligned
        length = lens_ref[b]
        blk = emo_ref[pl.ds(start, max_len_pad), :]          # (max_len_pad, C)
        row_ids = jax.lax.broadcasted_iota(jnp.int32, blk.shape, 0)
        pack_ref[t * max_len_pad:(t + 1) * max_len_pad, :] = jnp.where(
            row_ids < length, blk, jnp.zeros_like(blk))

    # One MXU matmul per grid step: (b_tile*max_len_pad, C) @ (C, H),
    # stored as a single unmasked, lane-dense write into the output block.
    out_ref[...] = jnp.dot(pack_ref[...], ebd_ref[...],
                           preferred_element_type=jnp.float32)


def emo_embedding_forward(emo_tensor, seqs_len, style_embedding, *, b_tile=None):
    """emo_tensor: (T_total, C) f32; seqs_len: (B,) int32 (concrete host data);
    style_embedding: (1, C, H) or (C, H) f32.  Returns (B, max(seqs_len), H)."""
    if style_embedding.ndim == 3:          # (1, C, H) parameter layout
        style_embedding = style_embedding[0]
    T, C = emo_tensor.shape
    H = style_embedding.shape[-1]

    lens = [int(v) for v in jax.device_get(seqs_len)]
    B = len(lens)

    # Mirror the PyTorch fallback when sum(seqs_len) != emo_tensor rows.
    total = sum(lens)
    if T != total:
        min_s = min(T, total)
        emo_tensor = emo_tensor[:min_s]
        if B == 1:
            lens[0] = min_s
        T = min_s

    max_len = max(lens)
    max_len_pad = max(8, _round_up(max_len, 8))   # sublane-dense tiles

    # Batch-tile size: target ~512 packed rows per matmul, but keep >= 2 grid
    # steps whenever possible (v7x shards parallel grid axes across 2 TCs).
    if b_tile is None:
        b_tile = max(1, min(B, 512 // max_len_pad))
        if B >= 2:
            b_tile = min(b_tile, (B + 1) // 2)
    num_tiles = -(-B // b_tile)
    b_pad = num_tiles * b_tile

    # Per-sequence 8-row-aligned placement in a flat padded tensor so the
    # in-kernel dynamic window load is sublane-aligned.
    starts = []
    off = 0
    for L in lens:
        starts.append(off)
        off += _round_up(L, 8)
    t_al_pad = _round_up(max(off, starts[-1] + max_len_pad), 8)

    emo_al = jnp.zeros((t_al_pad, C), jnp.float32)
    src = 0
    for i, L in enumerate(lens):
        if L > 0:
            emo_al = jax.lax.dynamic_update_slice(
                emo_al, emo_tensor[src:src + L].astype(jnp.float32),
                (starts[i], 0))
        src += L

    # Pad the scalar tables to b_pad (extra entries have length 0 -> zeros).
    starts_arr = jnp.array(starts + [0] * (b_pad - B), dtype=jnp.int32)
    lens_arr = jnp.array(lens + [0] * (b_pad - B), dtype=jnp.int32)

    m_tile = b_tile * max_len_pad            # packed rows per grid step

    kernel = functools.partial(_emo_kernel, b_tile=b_tile,
                               max_len_pad=max_len_pad)
    out_flat = pl.pallas_call(
        kernel,
        out_shape=jax.ShapeDtypeStruct((b_pad * max_len_pad, H), jnp.float32),
        grid_spec=pltpu.PrefetchScalarGridSpec(
            num_scalar_prefetch=2,          # starts, lens -> SMEM
            grid=(num_tiles,),
            in_specs=[
                # aligned flat emo tensor, VMEM resident (small for C=8)
                pl.BlockSpec((t_al_pad, C), lambda g, s, l: (0, 0)),
                # style embedding, VMEM resident
                pl.BlockSpec((C, H), lambda g, s, l: (0, 0)),
            ],
            out_specs=pl.BlockSpec((m_tile, H), lambda g, s, l: (g, 0)),
            scratch_shapes=[pltpu.VMEM((m_tile, C), jnp.float32)],
        ),
        compiler_params=pltpu.CompilerParams(
            dimension_semantics=("parallel",)),
    )(starts_arr, lens_arr, emo_al, style_embedding.astype(jnp.float32))

    # Free metadata reshape back to (B_pad, max_len_pad, H), then trim the
    # batch / length padding introduced for dense tiles.
    out_padded = out_flat.reshape(b_pad, max_len_pad, H)
    return out_padded[:B, :max_len, :]


def _ref_forward(emo_tensor, seqs_len, style_embedding):
    """Pure-JAX reference mirroring the PyTorch forward (eval mode)."""
    B = int(seqs_len.shape[0])
    C = emo_tensor.shape[1]
    max_len = int(jnp.max(seqs_len))
    packed = jnp.zeros((B, max_len, C), jnp.float32)
    start = 0
    for i in range(B):
        L = int(seqs_len[i])
        packed = packed.at[i, :L].set(emo_tensor[start:start + L])
        start += L
    return jnp.einsum("blc,ch->blh", packed, style_embedding)


if __name__ == "__main__":
    key = jax.random.PRNGKey(0)
    C_EMO = 8          # emo_channels
    IN_HIDDEN = 128    # in_hidden (= hidden dim of the bmm result)

    # seqs_len such that sum(seqs_len) == emo_tensor.shape[0]
    seqs_len = jnp.array([5, 12, 3, 9, 7], dtype=jnp.int32)
    T_TOTAL = int(jnp.sum(seqs_len))  # 36

    k1, k2 = jax.random.split(key)
    emo_tensor = jax.random.normal(k1, (T_TOTAL, C_EMO), dtype=jnp.float32)

    # style_embedding: xavier_normal_ on a (1, C, H) parameter
    std = math.sqrt(2.0 / (C_EMO * IN_HIDDEN + IN_HIDDEN))
    style_embedding = std * jax.random.normal(
        k2, (1, C_EMO, IN_HIDDEN), dtype=jnp.float32)

    # TODO(synk): nn.Dropout(p=0.1) is active only in training mode; forward is
    # implemented in eval mode (dropout == identity).

    out = emo_embedding_forward(emo_tensor, seqs_len, style_embedding)
    out = jax.block_until_ready(out)

    ref = _ref_forward(emo_tensor, seqs_len, style_embedding[0])
    assert out.shape == (5, 12, IN_HIDDEN), out.shape
    err = float(jnp.max(jnp.abs(out - ref)))
    assert err < 1e-5, err
    print("KERNEL_OK")
</pallas_src>

<mosaic_0001>
module attributes {stable_mosaic.version = 11 : i64} {
  func.func @_emo_kernel(%arg0: i32, %arg1: memref<6xi32, #tpu.memory_space<smem>>, %arg2: memref<6xi32, #tpu.memory_space<smem>>, %arg3: memref<64x8xf32, #tpu.memory_space<vmem>>, %arg4: memref<8x128xf32, #tpu.memory_space<vmem>>, %arg5: memref<48x128xf32, #tpu.memory_space<vmem>>, %arg6: memref<48x8xf32, #tpu.memory_space<vmem>>) attributes {dimension_semantics = [#tpu.dimension_semantics<parallel>], iteration_bounds = array<i64: 2>, scalar_prefetch = 2 : i64, scratch_operands = 1 : i64, tpu.core_type = #tpu.core_type<tc>, window_params = [{pipeline_mode = #tpu.pipeline_mode<synchronous>, transform_indices = @transform_0, window_bounds = array<i64: 64, 8>}, {pipeline_mode = #tpu.pipeline_mode<synchronous>, transform_indices = @transform_1, window_bounds = array<i64: 8, 128>}, {transform_indices = @transform_2, window_bounds = array<i64: 48, 128>}]} {
    %c3_i32 = arith.constant 3 : i32
    %0 = arith.muli %arg0, %c3_i32 : i32
    %c0_i32 = arith.constant 0 : i32
    %1 = arith.addi %0, %c0_i32 : i32
    %2 = arith.index_cast %1 : i32 to index
    %3 = memref.load %arg1[%2] : memref<6xi32, #tpu.memory_space<smem>>
    %4 = tpu.assume_multiple %3, 8 : i32
    %5 = arith.index_cast %1 : i32 to index
    %6 = memref.load %arg2[%5] : memref<6xi32, #tpu.memory_space<smem>>
    %7 = arith.index_cast %4 : i32 to index
    %c0 = arith.constant 0 : index
    %8 = vector.load %arg3[%7, %c0] : memref<64x8xf32, #tpu.memory_space<vmem>>, vector<16x8xf32>
    %9 = tpu.iota {dimensions = array<i32: 0>} : vector<16x8xi32>
    %10 = vector.broadcast %6 : i32 to vector<16x8xi32>
    %11 = arith.cmpi slt, %9, %10 : vector<16x8xi32>
    %cst = arith.constant 0.000000e+00 : f32
    %12 = vector.broadcast %cst : f32 to vector<16x8xf32>
    %13 = arith.select %11, %8, %12 : vector<16x8xi1>, vector<16x8xf32>
    %c0_0 = arith.constant 0 : index
    %c0_1 = arith.constant 0 : index
    %14 = vector.load %arg6[%c0_0, %c0_1] : memref<48x8xf32, #tpu.memory_space<vmem>>, vector<16x8xf32>
    tpu.vector_store %arg6[%c0_0, %c0_1], %13 {strides = array<i32>} : memref<48x8xf32, #tpu.memory_space<vmem>>, vector<16x8xf32>,
    %c3_i32_2 = arith.constant 3 : i32
    %15 = arith.muli %arg0, %c3_i32_2 : i32
    %c1_i32 = arith.constant 1 : i32
    %16 = arith.addi %15, %c1_i32 : i32
    %17 = arith.index_cast %16 : i32 to index
    %18 = memref.load %arg1[%17] : memref<6xi32, #tpu.memory_space<smem>>
    %19 = tpu.assume_multiple %18, 8 : i32
    %20 = arith.index_cast %16 : i32 to index
    %21 = memref.load %arg2[%20] : memref<6xi32, #tpu.memory_space<smem>>
    %22 = arith.index_cast %19 : i32 to index
    %c0_3 = arith.constant 0 : index
    %23 = vector.load %arg3[%22, %c0_3] : memref<64x8xf32, #tpu.memory_space<vmem>>, vector<16x8xf32>
    %24 = tpu.iota {dimensions = array<i32: 0>} : vector<16x8xi32>
    %25 = vector.broadcast %21 : i32 to vector<16x8xi32>
    %26 = arith.cmpi slt, %24, %25 : vector<16x8xi32>
    %cst_4 = arith.constant 0.000000e+00 : f32
    %27 = vector.broadcast %cst_4 : f32 to vector<16x8xf32>
    %28 = arith.select %26, %23, %27 : vector<16x8xi1>, vector<16x8xf32>
    %c16 = arith.constant 16 : index
    %c0_5 = arith.constant 0 : index
    %29 = vector.load %arg6[%c16, %c0_5] : memref<48x8xf32, #tpu.memory_space<vmem>>, vector<16x8xf32>
    tpu.vector_store %arg6[%c16, %c0_5], %28 {strides = array<i32>} : memref<48x8xf32, #tpu.memory_space<vmem>>, vector<16x8xf32>,
    %c3_i32_6 = arith.constant 3 : i32
    %30 = arith.muli %arg0, %c3_i32_6 : i32
    %c2_i32 = arith.constant 2 : i32
    %31 = arith.addi %30, %c2_i32 : i32
    %32 = arith.index_cast %31 : i32 to index
    %33 = memref.load %arg1[%32] : memref<6xi32, #tpu.memory_space<smem>>
    %34 = tpu.assume_multiple %33, 8 : i32
    %35 = arith.index_cast %31 : i32 to index
    %36 = memref.load %arg2[%35] : memref<6xi32, #tpu.memory_space<smem>>
    %37 = arith.index_cast %34 : i32 to index
    %c0_7 = arith.constant 0 : index
    %38 = vector.load %arg3[%37, %c0_7] : memref<64x8xf32, #tpu.memory_space<vmem>>, vector<16x8xf32>
    %39 = tpu.iota {dimensions = array<i32: 0>} : vector<16x8xi32>
    %40 = vector.broadcast %36 : i32 to vector<16x8xi32>
    %41 = arith.cmpi slt, %39, %40 : vector<16x8xi32>
    %cst_8 = arith.constant 0.000000e+00 : f32
    %42 = vector.broadcast %cst_8 : f32 to vector<16x8xf32>
    %43 = arith.select %41, %38, %42 : vector<16x8xi1>, vector<16x8xf32>
    %c32 = arith.constant 32 : index
    %c0_9 = arith.constant 0 : index
    %44 = vector.load %arg6[%c32, %c0_9] : memref<48x8xf32, #tpu.memory_space<vmem>>, vector<16x8xf32>
    tpu.vector_store %arg6[%c32, %c0_9], %43 {strides = array<i32>} : memref<48x8xf32, #tpu.memory_space<vmem>>, vector<16x8xf32>,
    %c0_10 = arith.constant 0 : index
    %c0_11 = arith.constant 0 : index
    %45 = vector.load %arg6[%c0_10, %c0_11] : memref<48x8xf32, #tpu.memory_space<vmem>>, vector<48x8xf32>
    %c0_12 = arith.constant 0 : index
    %c0_13 = arith.constant 0 : index
    %46 = vector.load %arg4[%c0_12, %c0_13] : memref<8x128xf32, #tpu.memory_space<vmem>>, vector<8x128xf32>
    %cst_14 = arith.constant dense<0.000000e+00> : vector<48x128xf32>
    %47 = tpu.matmul %45, %46, %cst_14 {dimension_numbers = #tpu.dot_dimension_numbers<[1], [0], [0], [1], [0, 0, 1, 1], [], []>} : vector<48x8xf32>, vector<8x128xf32>, vector<48x128xf32> -> vector<48x128xf32>
    %c0_15 = arith.constant 0 : index
    %c0_16 = arith.constant 0 : index
    %48 = vector.load %arg5[%c0_15, %c0_16] : memref<48x128xf32, #tpu.memory_space<vmem>>, vector<48x128xf32>
    tpu.vector_store %arg5[%c0_15, %c0_16], %47 {strides = array<i32>} : memref<48x128xf32, #tpu.memory_space<vmem>>, vector<48x128xf32>,
    return
  }
  func.func @transform_0(%arg0: i32, %arg1: memref<6xi32, #tpu.memory_space<smem>>, %arg2: memref<6xi32, #tpu.memory_space<smem>>) -> (i32, i32) {
    %c0_i32 = arith.constant 0 : i32
    %c0_i32_0 = arith.constant 0 : i32
    %c0_i32_1 = arith.constant 0 : i32
    return %c0_i32, %c0_i32_0 : i32, i32
  }
  func.func @transform_1(%arg0: i32, %arg1: memref<6xi32, #tpu.memory_space<smem>>, %arg2: memref<6xi32, #tpu.memory_space<smem>>) -> (i32, i32) {
    %c0_i32 = arith.constant 0 : i32
    %c0_i32_0 = arith.constant 0 : i32
    %c0_i32_1 = arith.constant 0 : i32
    return %c0_i32, %c0_i32_0 : i32, i32
  }
  func.func @transform_2(%arg0: i32, %arg1: memref<6xi32, #tpu.memory_space<smem>>, %arg2: memref<6xi32, #tpu.memory_space<smem>>) -> (i32, i32) {
    %c0_i32 = arith.constant 0 : i32
    %c0_i32_0 = arith.constant 0 : i32
    return %arg0, %c0_i32 : i32, i32
  }
}

</mosaic_0001>

<bundles_post_ra>
// kernel: tpu_custom_call.1
= control target key start
LH: loop header
LB: loop body
LE: loop exit
PB: predicated region body
PF: predicated region fallthrough
CT: control target
= control target key end

     0   :  { %s694_s0 = inlined_call_operand.vmem [shape: s32[6], index: 0, kind: input, shape index: {}]   ;;  %s695_s2 = inlined_call_operand.vmem [shape: f32[64,8], index: 2, kind: input, shape index: {}]   ;;  %s696_s3 = inlined_call_operand.vmem [shape: f32[8,128], index: 3, kind: input, shape index: {}]   ;;  %s697_s4 = inlined_call_operand.hbm [shape: f32[96,128], index: 4, kind: output, shape index: {}]   ;;  %s698_s1 = inlined_call_operand.vmem [shape: s32[6], index: 1, kind: input, shape index: {}]  }
   0x1   :  { %s9_s17 = sshll.u32 %s694_s0, 4  ;;  %s13_s20 = sshll.u32 %s698_s1, 4  ;;  %s10_s17 = int_to_ptr.vmem [resolvable:$true] %s9_s17  ;;  %s14_s20 = int_to_ptr.vmem [resolvable:$true] %s13_s20 }
   0x2   :  { %s448_s21 = scalar_lea.vmem %s10_s17, 16  ;;  %p453_p1 = scmp.lt.s32.totalorder %s10_s17, %s10_s17 }
   0x3   :  { %p449_p0 = scmp.ne.s32.totalorder %s10_s17, %s448_s21  ;;  %p454_p2 = scmp.lt.s32.totalorder %s448_s21, %s448_s21 }
   0x5   :  { %p455_p3 = por %p454_p2, %p453_p1 }
   0x7   :  { %p456_p4 = pnand %p455_p3, %p449_p0 }
   0x9   :  { %459 = shalt.err (!%p456_p4)  }
   0xa   :  { %s536_s22 = smov [#allocation4]   ;;  %s460_s23 = scalar_lea.vmem %s14_s20, 16 }
   0xb   :  { %12 = dma.vmem_to_smem %s10_s17, 16, %s536_s22, [#allocation3] }
   0xc   :  { %p461_p5 = scmp.ne.s32.totalorder %s14_s20, %s460_s23  ;;  %p465_p6 = scmp.lt.s32.totalorder %s14_s20, %s14_s20 }
   0xd   :  { %p466_p7 = scmp.lt.s32.totalorder %s460_s23, %s460_s23 }
   0xf   :  { %p467_p8 = por %p466_p7, %p465_p6 }
  0x11   :  { %p468_p9 = pnand %p467_p8, %p461_p5 }
  0x13   :  { %471 = shalt.err (!%p468_p9)  }
  0x14   :  { %s537_s0 = smov [#allocation5]  }
  0x15   :  { %16 = dma.vmem_to_smem %s14_s20, 16, %s537_s0, [#allocation3] }
  0x16   :  { %514 = dma.done.wait [#allocation3], 32 }
  0x17   :  { %515 = vsyncadd [#allocation3], 4294967264 }
  0x18   :  { %18 = sfence }
  0x19   :  { %19 = vsyncpa [#allocation7], 0 }
  0x1a   :  { %21 = vsyncpa [#allocation7 + $0x1], 0  ;;  %s572_s1 = smov 0   ;;  %s574_s24 = smov 0  }
  0x1b   :  { %s576_s25 = smov 0   ;;  %s578_s26 = smov 0  }
  0x1c LB: > { %s593_s27 = sadd.s32 4294967295, %s534_s26   ;;  %s371_s28 = sadd.s32 4294967294, %s534_s26   ;;  %s534_s26 = sphi %s578_s26, %s704_s26   ;;  %s530_s25 = sphi %s576_s25, %s703_s25   ;;  %s526_s24 = sphi %s574_s24, %s702_s24   ;;  %s522_s1 = sphi %s572_s1, %s701_s1  }
  0x1d   : > { %s597_s29 = sadd.s32 1, %s534_s26   ;;  %s76_s30 = sadd.s32 1, %s530_s25 }
  0x1e   : > { %s73_s5 = ssub.s32 %s534_s26, %s597_s29  ;;  %p86_p10 = scmp.ne.s32.totalorder %s530_s25, %s526_s24 }
  0x1f   : > { %p74_p11 = scmp.eq.s32.totalorder %s73_s5, 0  ;;  %p87_p12 = scmp.eq.s32.totalorder %s593_s27, 1 }
  0x20   : > { %p92_p13 = scmp.ne.s32.totalorder %s526_s24, %s522_s1  ;;  %p93_p0 = scmp.eq.s32.totalorder %s371_s28, 1 }
  0x21   : > { %s608_s6 = scalar_select %p74_p11, %s530_s25, %s76_s30  }
  0x22   : > { %p610_p1 = por %p87_p12, %p86_p10  ;;  %p614_p2 = por %p93_p0, %p92_p13 }
  0x23   : > { %p373_p3 = scmp.ge.s32.totalorder %s534_s26, 1  ;;  %p117_p4 = scmp.lt.s32.totalorder %s534_s26, 3 }
  0x25   : > { %p118_p5 = pnand %p373_p3, %p117_p4 }
  0x26   : > { %s135_s11 = smul.u32 (!%p118_p5), 3, %s593_s27  ;;  %s131_s10 = sand.u32 (!%p118_p5), 1, %s526_s24  }
  0x27   : > { %121 = sbr.rel (%p118_p5) target bundleno = 273 (0x111), region = 28 }
  0x28   : > { %s152_s12 = sadd.s32 (!%p118_p5), 1, %s135_s11  ;;  %s136_s13 = sld [smem:[#allocation4 + %s135_s11]] (!%p118_p5) }
  0x29   : > { %s153_s14 = sld [smem:[#allocation4 + %s152_s12]] (!%p118_p5)  ;;  %s165_s15 = sadd.s32 (!%p118_p5), 2, %s135_s11 }
  0x2a   : > { %s154_s16 = sld [smem:[#allocation5 + %s152_s12]] (!%p118_p5)  ;;  %s383_s12 = smul.u32 (!%p118_p5), 768, %s593_s27 }
  0x2b   : > { %s137_s17 = sld [smem:[#allocation5 + %s135_s11]] (!%p118_p5)  ;;  %s404_s11 = smul.u32 (!%p118_p5), 48, %s131_s10 }
  0x2c   : > { %v184_v0 = vld [vmem:[%s696_s3] sm:$0xff]  ;;  %v141_v1 = vlaneseq  ;;  %s166_s18 = sld [smem:[#allocation4 + %s165_s15]]  ;;  %vm149_vm0 = vcmask 64512   ;;  %s652_s27 = scalar_lea.hbm %s697_s4, %s383_s12 }
  0x2d   : > { %402 = vmatprep.subr.mxu1 %v184_v0  ;;  %391 = vmatprep.subr.mxu0 %v184_v0  ;;  %s167_s19 = sld [smem:[#allocation5 + %s165_s15]] }
  0x2e   : > { %403 = vmatpush3.msra.mxu1 %v184_v0  ;;  %392 = vmatpush3.msra.mxu0 %v184_v0  ;;  %v142_v2 = vshrl.u32 %v141_v1, 7  ;;  %s138_s22 = scalar_lea.vmem %s695_s2, %s136_s13  ;;  %s133_s13 = scalar_lea.vmem [#allocation6], %s404_s11 }
  0x2f   : > { %s155_s28 = scalar_lea.vmem %s695_s2, %s153_s14  ;;  %v139_v4 = vld [vmem:[%s138_s22] sm:$0xff]  ;;  %v140_v8 = vld [vmem:[%s138_s22 + $0x8] sm:$0xff]  ;;  %s318_s14 = sshll.u32 %s133_s13, 4  ;;  %s647_s14 = int_to_ptr.vmem [resolvable:$true] %s318_s14 }
  0x30   : > { %v143_v3 = vadd.s32 8, %v142_v2  ;;  %v156_v5 = vld [vmem:[%s155_s28] sm:$0xff]  ;;  %v157_v6 = vld [vmem:[%s155_s28 + $0x8] sm:$0xff]  ;;  %v158_v7 = vstv %s154_s16 }
  0x31   : > { %vm159_vm1 = vcmp.lt.s32.totalorder %v142_v2, %v158_v7  ;;  %v144_v9 = vstv %s137_s17  ;;  %s654_s17 = scalar_lea.sflag [#allocation7], %s131_s10 }
  0x32   : > { %vm160_vm2 = vcmp.lt.s32.totalorder %v143_v3, %v158_v7  ;;  %v161_v10 = vsel %vm159_vm1, %v156_v5, 0.0  ;;  %vm145_vm3 = vcmp.lt.s32.totalorder %v142_v2, %v144_v9  ;;  %vm146_vm4 = vcmp.lt.s32.totalorder %v143_v3, %v144_v9  ;;  %s168_s9 = scalar_lea.vmem %s695_s2, %s166_s18  ;;  %s472_s18 = scalar_lea.vmem %s647_s14, 768 }
  0x33   : > { %v162_v11 = vsel %vm160_vm2, %v157_v6, 0.0  ;;  %163 = vst.msk [vmem:[#allocation2 + $0x10] sm:$0xff] %vm149_vm0, %v161_v10  ;;  %v147_v12 = vsel %vm145_vm3, %v139_v4, 0.0  ;;  %v148_v13 = vsel %vm146_vm4, %v140_v8, 0.0  ;;  %v169_v14 = vld [vmem:[%s168_s9] sm:$0xff]  ;;  %v171_v15 = vstv %s167_s19  ;;  %v170_v16 = vld [vmem:[%s168_s9 + $0x8] sm:$0xff]  ;;  %p473_p6 = scmp.ne.s32.totalorder %s647_s14, %s472_s18 }
  0x34   : > { %164 = vst.msk [vmem:[#allocation2 + $0x18] sm:$0xff] %vm149_vm0, %v162_v11  ;;  %150 = vst.msk [vmem:[#allocation2] sm:$0xff] %vm149_vm0, %v147_v12  ;;  %vm172_vm5 = vcmp.lt.s32.totalorder %v142_v2, %v171_v15  ;;  %vm173_vm6 = vcmp.lt.s32.totalorder %v143_v3, %v171_v15  ;;  %s538_s19 = smov [#allocation6]  }
  0x35   : > { %151 = vst.msk [vmem:[#allocation2 + $0x8] sm:$0xff] %vm149_vm0, %v148_v13  ;;  %v174_v17 = vsel %vm172_vm5, %v169_v14, 0.0  ;;  %v175_v18 = vsel %vm173_vm6, %v170_v16, 0.0  ;;  %p474_p7 = pnand %p473_p6, %p610_p1  ;;  %s476_s20 = sshll.u32 %s538_s19, 4  ;;  %s477_s20 = int_to_ptr.vmem [resolvable:$false] %s476_s20 }
  0x36   : > { %176 = vst.msk [vmem:[#allocation2 + $0x20] sm:$0xff] %vm149_vm0, %v174_v17  ;;  %177 = vst.msk [vmem:[#allocation2 + $0x28] sm:$0xff] %vm149_vm0, %v175_v18  ;;  %s478_s21 = scalar_lea.vmem %s477_s20, 1536  ;;  %p479_p9 = scmp.lt.s32.totalorder %s647_s14, %s477_s20 }
  0x37   : > { %p475_p8 = pneg %p474_p7  ;;  %p480_p10 = scmp.lt.s32.totalorder %s478_s21, %s472_s18 }
  0x39   : > { %p481_p11 = por %p480_p10, %p479_p9 }
  0x3a   : > { %v180_v19 = vld [vmem:[#allocation2 + $0x10] sm:$0xff] }
  0x3b   : > { %v181_v20 = vld [vmem:[#allocation2 + $0x18] sm:$0xff]  ;;  %396 = vmatprep.mubr.msk.f32.mxu1 %vm149_vm0, %v180_v19  ;;  %v178_v21 = vld [vmem:[#allocation2] sm:$0xff]  ;;  %p482_p12 = pnand %p481_p11, %p475_p8 }
  0x3c   : > { %v179_v22 = vld [vmem:[#allocation2 + $0x8] sm:$0xff]  ;;  %397 = vmatmul.mubr.msk.f32.vlgmr.msra.gmra.mxu1 %vm149_vm0, %v181_v20  ;;  %393 = vmatprep.mubr.msk.f32.mxu0 %vm149_vm0, %v178_v21 }
  0x3d   : > { %394 = vmatmul.mubr.msk.f32.vlgmr.msra.gmra.mxu0 %vm149_vm0, %v179_v22  ;;  %v182_v23 = vld [vmem:[#allocation2 + $0x20] sm:$0xff]  ;;  %v183_v24 = vld [vmem:[#allocation2 + $0x28] sm:$0xff] }
  0x3e   : > { %399 = vmatprep.mubr.msk.f32.mxu1 %vm149_vm0, %v182_v23 }
  0x40   : > { %400 = vmatmul.mubr.msk.f32.gmra.mxu1 %vm149_vm0, %v183_v24 }
  0xfc   : > { %v398_v25 = vpop.f32.mrf.mxu1 }
  0xfd   : > { %301 = vst [vmem:[%s133_s13 + $0x18] sm:$0xff] %v398_v25  ;;  %v395_v26 = vpop.f32.mrf.mxu0 }
  0xfe   : > { %299 = vst [vmem:[%s133_s13 + $0x8] sm:$0xff] %v395_v26  ;;  %v279_v27 = vpop.f32.mrf.mxu1 }
  0xff   : > { %300 = vst [vmem:[%s133_s13 + $0x10] sm:$0xff] %v279_v27  ;;  %v269_v28 = vpop.f32.mrf.mxu0 }
 0x100   : > { %298 = vst [vmem:[%s133_s13] sm:$0xff] %v269_v28  ;;  %v401_v29 = vpop.f32.mrf.mxu1 }
 0x101   : > { %303 = vst [vmem:[%s133_s13 + $0x28] sm:$0xff] %v401_v29 }
 0x102   : > { %v289_v30 = vpop.f32.mrf.mxu1 }
 0x103   : > { %302 = vst [vmem:[%s133_s13 + $0x20] sm:$0xff] %v289_v30 }
 0x104   : > { %485 = shalt.err (!%p482_p12)
}
 0x105   : > { %s486_s22 = scalar_lea.hbm %s652_s27, 768  ;;  %s490_s28 = scalar_lea.hbm %s697_s4, 1536 }
 0x106   : > { %p487_p13 = scmp.ne.s32.totalorder %s652_s27, %s486_s22  ;;  %p491_p4 = scmp.lt.s32.totalorder %s652_s27, %s697_s4 }
 0x107   : > { %p492_p5 = scmp.lt.s32.totalorder %s490_s28, %s486_s22 }
 0x108   : > { %p488_p0 = pnand %p487_p13, %p610_p1 }
 0x109   : > { %p493_p6 = por %p492_p5, %p491_p4 }
 0x10a   : > { %p489_p3 = pneg %p488_p0 }
 0x10c   : > { %p494_p7 = pnand %p493_p6, %p489_p3 }
 0x10e   : > { %497 = shalt.err (!%p494_p7)
}
 0x10f   : > { %s539_s9 = smov 128   ;;  %s540_s10 = smov 8  }
 0x110   : > { %405 = dma.vmem_to_hbm [thread:$0]  (%p610_p1), %s647_s14, 768, %s652_s27, %s654_s17, %s539_s9, %s539_s9, %s540_s10  }
 0x111 PF: > { %p411_p8 = scmp.ge.s32.totalorder %s534_s26, 2  ;;  %s333_s11 = sand.u32 1, %s522_s1  }
 0x112   : > { %s334_s12 = scalar_lea.sflag [#allocation7], %s333_s11 }
 0x113   : > { %p408_p9 = pnand %p411_p8, %p614_p2 }
 0x115   : > { %p409_p10 = pneg %p408_p9 }
 0x117   : > { %517 = dma.done.wait (%p409_p10), %s334_s12, 768  }
 0x118   : > { %519 = vsyncadd (%p409_p10), %s334_s12, 4294966528  ;;  %p24_p11 = scmp.ge.s32.totalorder %s597_s29, 4   ;;  %s701_s1 = smov %s526_s24 }
 0x119   : > { %s702_s24 = smov %s530_s25  ;;  %s703_s25 = smov %s608_s6 }
 0x11a   : > { %s704_s26 = smov %s597_s29  ;;  %26 = sbr.rel (!%p24_p11) target bundleno = 28 (0x1c), region = 63 }
 0x11f   :  { %339 = vsyncpa [#allocation7], 1 }
 0x120   :  { %341 = vsyncpa [#allocation7 + $0x1], 1 }

</bundles_post_ra>
